<compile_context>
chip_gen: v5e
topology: v5e:2x2
jax: 0.10.0
libtpu: 0.0.40
codegen_flags: <defaults>
</compile_context>

<pallas_src>
import math

import jax
import jax.numpy as jnp
from jax import lax
from jax.experimental import pallas as pl
from jax.experimental.pallas import tpu as pltpu


def _dibs_kernel(alpha_ref, x_ref, w_ref, v_ref, b_ref, out_ref, g_ref):
    alpha = alpha_ref[0, 0]                      # SMEM scalar

    # Z = v.T @ w  == (w.T @ v).T, computed directly in (n_outputs, n_inputs)
    # layout; the contraction orientation is handled by the MXU (no transpose).
    z = lax.dot_general(
        v_ref[...], w_ref[...],
        dimension_numbers=(((0,), (0,)), ((), ())),
        preferred_element_type=jnp.float32,
    )                                            # (n_outputs, n_inputs) f32
    g = jax.nn.sigmoid(alpha * z)                # sigmoid stays in f32 (EUP)
    g_ref[...] = g.astype(g_ref.dtype)

    # out = x @ G.T + bias  (F.linear) — contract on the shared n_inputs axis
    # without materializing G.T.
    out = lax.dot_general(
        x_ref[...], g,
        dimension_numbers=(((1,), (1,)), ((), ())),
        preferred_element_type=jnp.float32,
    ) + b_ref[...]                               # (B, n_outputs) + (1, n_outputs)
    out_ref[...] = out.astype(out_ref.dtype)


def deep_ens_dibs_forward(x, w, v, bias, alpha=1.0):
    """x: (B, n_inputs); w: (k, n_inputs); v: (k, n_outputs); bias: (n_outputs,)."""
    B, n_in = x.shape
    k, n_in_w = w.shape
    k_v, n_out = v.shape
    assert n_in_w == n_in and k_v == k

    b2d = bias.reshape(1, n_out)
    alpha_arr = jnp.asarray(alpha, jnp.float32).reshape(1, 1)

    vmem = pl.BlockSpec(memory_space=pltpu.MemorySpace.VMEM)
    smem = pl.BlockSpec(memory_space=pltpu.MemorySpace.SMEM)

    out, G = pl.pallas_call(
        _dibs_kernel,
        out_shape=(
            jax.ShapeDtypeStruct((B, n_out), x.dtype),
            jax.ShapeDtypeStruct((n_out, n_in), x.dtype),
        ),
        in_specs=[smem, vmem, vmem, vmem, vmem],
        out_specs=(vmem, vmem),
    )(alpha_arr, x, w, v, b2d)
    return out, G


def _kaiming_uniform(key, shape, a=math.sqrt(5)):
    # torch.nn.init.kaiming_uniform_ with fan_in = shape[1]
    fan_in = shape[1]
    gain = math.sqrt(2.0 / (1.0 + a * a))
    bound = gain * math.sqrt(3.0 / fan_in)
    return jax.random.uniform(key, shape, jnp.float32, -bound, bound)


if __name__ == "__main__":
    # Small shapes; lane axes (n_inputs, n_outputs) sized to 128 so the
    # kernel's stores are lane-dense.
    B, n_inputs, n_outputs, k_hidden = 8, 128, 128, 32

    key = jax.random.PRNGKey(0)
    kx, kw, kv, kb = jax.random.split(key, 4)

    x = jax.random.normal(kx, (B, n_inputs), jnp.float32)
    w = _kaiming_uniform(kw, (k_hidden, n_inputs))
    v = _kaiming_uniform(kv, (k_hidden, n_outputs))
    # bias bound uses fan_in of self.weight (n_outputs, n_inputs) -> n_inputs
    b_bound = 1.0 / math.sqrt(n_inputs)
    bias = jax.random.uniform(kb, (n_outputs,), jnp.float32, -b_bound, b_bound)

    alpha = 1.0
    out, G = deep_ens_dibs_forward(x, w, v, bias, alpha=alpha)
    out, G = jax.block_until_ready((out, G))

    # Reference (plain JAX) check of exact semantics.
    Z = (w.T @ v).T                              # (n_outputs, n_inputs)
    G_ref = jax.nn.sigmoid(alpha * Z)
    out_ref = x @ G_ref.T + bias
    assert jnp.allclose(G, G_ref, atol=1e-5, rtol=1e-5)
    assert jnp.allclose(out, out_ref, atol=1e-5, rtol=1e-5)

    print("KERNEL_OK")
</pallas_src>

<mosaic_0001>
module attributes {stable_mosaic.version = 11 : i64} {
  func.func @_dibs_kernel(%arg0: memref<1x1xf32, #tpu.memory_space<smem>>, %arg1: memref<8x128xf32, #tpu.memory_space<vmem>>, %arg2: memref<32x128xf32, #tpu.memory_space<vmem>>, %arg3: memref<32x128xf32, #tpu.memory_space<vmem>>, %arg4: memref<1x128xf32, #tpu.memory_space<vmem>>, %arg5: memref<8x128xf32, #tpu.memory_space<vmem>>, %arg6: memref<128x128xf32, #tpu.memory_space<vmem>>) attributes {dimension_semantics = [], scalar_prefetch = 0 : i64, scratch_operands = 0 : i64, tpu.core_type = #tpu.core_type<tc>} {
    %c0 = arith.constant 0 : index
    %c0_0 = arith.constant 0 : index
    %0 = memref.load %arg0[%c0, %c0_0] : memref<1x1xf32, #tpu.memory_space<smem>>
    %c0_1 = arith.constant 0 : index
    %c0_2 = arith.constant 0 : index
    %1 = vector.load %arg3[%c0_1, %c0_2] : memref<32x128xf32, #tpu.memory_space<vmem>>, vector<32x128xf32>
    %c0_3 = arith.constant 0 : index
    %c0_4 = arith.constant 0 : index
    %2 = vector.load %arg2[%c0_3, %c0_4] : memref<32x128xf32, #tpu.memory_space<vmem>>, vector<32x128xf32>
    %cst = arith.constant dense<0.000000e+00> : vector<128x128xf32>
    %3 = tpu.matmul %1, %2, %cst {dimension_numbers = #tpu.dot_dimension_numbers<[0], [0], [1], [1], [0, 1, 1, 1], [], []>} : vector<32x128xf32>, vector<32x128xf32>, vector<128x128xf32> -> vector<128x128xf32>
    %4 = vector.broadcast %0 : f32 to vector<128x128xf32>
    %5 = arith.mulf %4, %3 : vector<128x128xf32>
    %6 = arith.negf %5 : vector<128x128xf32>
    %7 = math.exp %6 : vector<128x128xf32>
    %cst_5 = arith.constant 1.000000e+00 : f32
    %8 = vector.broadcast %cst_5 : f32 to vector<128x128xf32>
    %9 = arith.addf %8, %7 : vector<128x128xf32>
    %10 = arith.divf %8, %9 : vector<128x128xf32>
    %c0_6 = arith.constant 0 : index
    %c0_7 = arith.constant 0 : index
    %11 = vector.load %arg6[%c0_6, %c0_7] : memref<128x128xf32, #tpu.memory_space<vmem>>, vector<128x128xf32>
    tpu.vector_store %arg6[%c0_6, %c0_7], %10 {strides = array<i32>} : memref<128x128xf32, #tpu.memory_space<vmem>>, vector<128x128xf32>,
    %c0_8 = arith.constant 0 : index
    %c0_9 = arith.constant 0 : index
    %12 = vector.load %arg1[%c0_8, %c0_9] : memref<8x128xf32, #tpu.memory_space<vmem>>, vector<8x128xf32>
    %cst_10 = arith.constant dense<0.000000e+00> : vector<8x128xf32>
    %13 = tpu.matmul %12, %10, %cst_10 {dimension_numbers = #tpu.dot_dimension_numbers<[1], [1], [0], [0], [0, 0, 1, 0], [], []>} : vector<8x128xf32>, vector<128x128xf32>, vector<8x128xf32> -> vector<8x128xf32>
    %c0_11 = arith.constant 0 : index
    %c0_12 = arith.constant 0 : index
    %14 = vector.load %arg4[%c0_11, %c0_12] : memref<1x128xf32, #tpu.memory_space<vmem>>, vector<1x128xf32>
    %15 = vector.broadcast %14 : vector<1x128xf32> to vector<8x128xf32>
    %16 = arith.addf %13, %15 : vector<8x128xf32>
    %c0_13 = arith.constant 0 : index
    %c0_14 = arith.constant 0 : index
    %17 = vector.load %arg5[%c0_13, %c0_14] : memref<8x128xf32, #tpu.memory_space<vmem>>, vector<8x128xf32>
    tpu.vector_store %arg5[%c0_13, %c0_14], %16 {strides = array<i32>} : memref<8x128xf32, #tpu.memory_space<vmem>>, vector<8x128xf32>,
    return
  }
}

</mosaic_0001>

<bundles_post_ra>
// kernel: tpu_custom_call.1
= control target key start
LH: loop header
LB: loop body
LE: loop exit
PB: predicated region body
PF: predicated region fallthrough
CT: control target
= control target key end

     0   :  { %13 = vsyncpa [#allocation4], 0  ;;  %s1019_s0 = inlined_call_operand.<no memory space> [shape: f32[1,1], index: 0, kind: input, shape index: {}]   ;;  %s1020_s1 = inlined_call_operand.hbm [shape: f32[8,128], index: 1, kind: input, shape index: {}]   ;;  %s1021_s2 = inlined_call_operand.hbm [shape: f32[32,128], index: 2, kind: input, shape index: {}]   ;;  %s1022_s3 = inlined_call_operand.hbm [shape: f32[32,128], index: 3, kind: input, shape index: {}]   ;;  %s1023_s4 = inlined_call_operand.vmem [shape: f32[1,128], index: 4, kind: input, shape index: {}]   ;;  %s1024_s5 = inlined_call_operand.hbm [shape: f32[8,128], index: 5, kind: output, shape index: {0}]   ;;  %s1025_s6 = inlined_call_operand.hbm [shape: f32[128,128], index: 6, kind: output, shape index: {1}]  }
   0x1   :  { %14 = vsyncpa [#allocation7], 0 }
   0x2   :  { %15 = vsyncpa [#allocation5], 0  ;;  %s34_s23 = sshll.u32 %s1021_s2, 4  ;;  %s35_s23 = int_to_ptr.hbm [resolvable:$true] %s34_s23 }
   0x3   :  { %16 = vsyncpa [#allocation11], 0  ;;  %s865_s24 = smov [#allocation6]   ;;  %s24_s28 = sshll.u32 %s1020_s1, 4  ;;  %s25_s28 = int_to_ptr.hbm [resolvable:$true] %s24_s28 }
   0x4   :  { %s36_s25 = sshll.u32 %s865_s24, 4  ;;  %s866_s29 = smov 128   ;;  %s37_s25 = int_to_ptr.vmem [resolvable:$true] %s36_s25 }
   0x5   :  { %s867_s30 = smov 8   ;;  %s868_s7 = smov [#allocation3]  }
   0x6   :  { %42 = dma.hbm_to_vmem [thread:$0]  %s35_s23, 512, %s37_s25, [#allocation7], %s866_s29, %s866_s29, %s867_s30  }
   0x7   :  { %s26_s8 = sshll.u32 %s868_s7, 4  ;;  %s47_s10 = sshll.u32 %s1022_s3, 4  ;;  %s27_s8 = int_to_ptr.vmem [resolvable:$true] %s26_s8  ;;  %s48_s10 = int_to_ptr.hbm [resolvable:$true] %s47_s10 }
   0x8   :  { %29 = dma.hbm_to_vmem [thread:$0]  %s25_s28, 128, %s27_s8, [#allocation4]  }
   0x9   :  { %s869_s11 = smov [#allocation8]  }
   0xa   :  { %s49_s12 = sshll.u32 %s869_s11, 4  ;;  %s50_s12 = int_to_ptr.vmem [resolvable:$true] %s49_s12 }
   0xb   :  { %55 = dma.hbm_to_vmem [thread:$0]  %s48_s10, 512, %s50_s12, [#allocation7], %s866_s29, %s866_s29, %s867_s30  }
   0xc   :  { %857 = dma.done.wait [#allocation4], 128  }
   0xd   :  { %858 = vsyncadd [#allocation4], 4294967168 }
   0xe   :  { %859 = dma.done.wait [#allocation7], 1024  }
   0xf   :  { %860 = vsyncadd [#allocation7], 4294966272  ;;  %v71_v0 = vld [vmem:[#allocation8] sm:$0xff]  ;;  %v78_v1 = vld [vmem:[#allocation6 + $0x18] sm:$0xff]  ;;  %vm111_vm0 = vcmask 261120   ;;  %v941_v24 = vstv %s1019_s0  ;;  %s870_s0 = smov [#allocation10]  }
  0x10   :  { %79 = vxpose.xlu0.b32.start [1/4] (short) %v71_v0, 128  ;;  %v77_v2 = vld [vmem:[#allocation6 + $0x10] sm:$0xff]  ;;  %172 = vmatpush.msra.mxu0 %v78_v1  ;;  %v76_v3 = vld [vmem:[#allocation6 + $0x8] sm:$0xff]  ;;  %v75_v4 = vld [vmem:[#allocation6] sm:$0xff]  ;;  %s603_s13 = sshll.u32 %s870_s0, 4  ;;  %s605_s16 = sshll.u32 %s1025_s6, 4  ;;  %s604_s13 = int_to_ptr.vmem [resolvable:$true] %s603_s13  ;;  %s606_s16 = int_to_ptr.hbm [resolvable:$true] %s605_s16 }
  0x11   :  { %656 = vmatpush.msra.mxu2 %v78_v1  ;;  %657 = vmatpush.msra.mxu3 %v78_v1  ;;  %v72_v5 = vld [vmem:[#allocation8 + $0x8] sm:$0xff]  ;;  %v73_v6 = vld [vmem:[#allocation8 + $0x10] sm:$0xff]  ;;  %v74_v7 = vld [vmem:[#allocation8 + $0x18] sm:$0xff]  ;;  %s871_s19 = smov [#allocation9]   ;;  %s595_s23 = sshll.u32 %s1024_s5, 4  ;;  %s596_s23 = int_to_ptr.hbm [resolvable:$true] %s595_s23 }
  0x12   :  { %173 = vmatpush.msra.mxu0 %v77_v2  ;;  %s593_s20 = sshll.u32 %s871_s19, 4  ;;  %s594_s20 = int_to_ptr.vmem [resolvable:$true] %s593_s20 }
  0x13   :  { %658 = vmatpush.msra.mxu2 %v77_v2  ;;  %659 = vmatpush.msra.mxu3 %v77_v2 }
  0x14   :  { %174 = vmatpush.msra.mxu0 %v76_v3 }
  0x15   :  { %660 = vmatpush.msra.mxu2 %v76_v3  ;;  %661 = vmatpush.msra.mxu3 %v76_v3 }
  0x16   :  { %175 = vmatpush.msra.mxu0 %v75_v4 }
  0x17   :  { %662 = vmatpush.msra.mxu2 %v75_v4  ;;  %663 = vmatpush.msra.mxu3 %v75_v4 }
  0x18   :  { %80 = vxpose.xlu0.b32.cont [2/4] (short) %v72_v5, 128 }
  0x20   :  { %81 = vxpose.xlu0.b32.cont [3/4] (short) %v73_v6, 128 }
  0x28   :  { %82 = vxpose.xlu0.b32.end [4/4] (short) %v74_v7, 128 }
  0xb4   :  { %v95_v8 = vpop.trf.xlu0 }
  0xb5   :  { %624 = vmatmul.msk.f32.vlgmr.msra.gmra.mxu0 %vm111_vm0, %v95_v8 }
  0xbc   :  { %v96_v9 = vpop.trf.xlu0 }
  0xbd   :  { %625 = vmatmul.msk.f32.gmra.mxu0 %vm111_vm0, %v96_v9 }
  0xc4   :  { %v97_v10 = vpop.trf.xlu0 }
  0xc5   :  { %626 = vmatmul.msk.f32.gmra.mxu0 %vm111_vm0, %v97_v10 }
  0xcc   :  { %v98_v11 = vpop.trf.xlu0 }
  0xcd   :  { %627 = vmatmul.msk.f32.gmra.mxu0 %vm111_vm0, %v98_v11 }
  0xd4   :  { %v99_v12 = vpop.trf.xlu0 }
  0xd5   :  { %628 = vmatmul.msk.f32.gmra.mxu0 %vm111_vm0, %v99_v12 }
  0xdc   :  { %v100_v13 = vpop.trf.xlu0 }
  0xdd   :  { %629 = vmatmul.msk.f32.gmra.mxu0 %vm111_vm0, %v100_v13 }
  0xe4   :  { %v101_v14 = vpop.trf.xlu0 }
  0xe5   :  { %630 = vmatmul.msk.f32.vlgmr.msra.gmra.mxu2 %vm111_vm0, %v101_v14 }
  0xec   :  { %v102_v15 = vpop.trf.xlu0 }
  0xed   :  { %631 = vmatmul.msk.f32.gmra.mxu2 %vm111_vm0, %v102_v15 }
  0xf4   :  { %v103_v16 = vpop.trf.xlu0 }
  0xf5   :  { %632 = vmatmul.msk.f32.gmra.mxu2 %vm111_vm0, %v103_v16 }
  0xfc   :  { %v104_v17 = vpop.trf.xlu0 }
  0xfd   :  { %633 = vmatmul.msk.f32.gmra.mxu2 %vm111_vm0, %v104_v17 }
 0x104   :  { %v105_v18 = vpop.trf.xlu0 }
 0x105   :  { %634 = vmatmul.msk.f32.gmra.mxu2 %vm111_vm0, %v105_v18 }
 0x10c   :  { %v106_v19 = vpop.trf.xlu0 }
 0x10d   :  { %635 = vmatmul.msk.f32.gmra.mxu2 %vm111_vm0, %v106_v19 }
 0x114   :  { %v107_v20 = vpop.trf.xlu0 }
 0x115   :  { %636 = vmatmul.msk.f32.vlgmr.msra.gmra.mxu3 %vm111_vm0, %v107_v20 }
 0x11c   :  { %v108_v21 = vpop.trf.xlu0 }
 0x11d   :  { %637 = vmatmul.msk.f32.gmra.mxu3 %vm111_vm0, %v108_v21 }
 0x124   :  { %v109_v22 = vpop.trf.xlu0 }
 0x125   :  { %638 = vmatmul.msk.f32.gmra.mxu3 %vm111_vm0, %v109_v22 }
 0x12c   :  { %v110_v23 = vpop.trf.xlu0 }
 0x12d   :  { %639 = vmatmul.msk.f32.gmra.mxu3 %vm111_vm0, %v110_v23 }
 0x132   :  { %v177_v25 = vpop.f32.mrf.mxu0 }
 0x133   :  { %v226_v26 = vmul.f32 %v941_v24, %v177_v25 }
 0x135   :  { %v640_v27 = vmul.f32 -1.442695, %v226_v26 }
 0x137   :  { %673 = vpow2.f32 %v640_v27 }
 0x13a   :  { %v180_v28 = vpop.f32.mrf.mxu0 }
 0x13b   :  { %v227_v29 = vmul.f32 %v941_v24, %v180_v28 }
 0x13d   :  { %v674_v30 = vpop.eup %673  ;;  %v641_v31 = vmul.f32 -1.442695, %v227_v29 }
 0x13e   :  { %v290_v32 = vadd.f32 1.0, %v674_v30 }
 0x13f   :  { %675 = vpow2.f32 %v641_v31 }
 0x140   :  { %677 = vrcp.f32 %v290_v32  ;;  %v317_v44 = vand.u32 2147483648, %v290_v32  ;;  %v315_v45 = vand.u32 2147483647, %v290_v32  ;;  %vm311_vm2 = vweird.f32 %v290_v32 }
 0x142   :  { %v183_v33 = vpop.f32.mrf.mxu0  ;;  %v318_v53 = vor.u32 1.1754944e-38, %v317_v44  ;;  %vm316_vm4 = vcmp.eq.f32.partialorder %v315_v45, 8.507059e+37 }
 0x143   :  { %v228_v34 = vmul.f32 %v941_v24, %v183_v33 }
 0x145   :  { %v676_v35 = vpop.eup %675  ;;  %v642_v36 = vmul.f32 -1.442695, %v228_v34 }
 0x146   :  { %v678_v37 = vpop.eup %677  ;;  %v291_v38 = vadd.f32 1.0, %v676_v35 }
 0x147   :  { %679 = vpow2.f32 %v642_v36  ;;  %v307_v39 = vmul.f32 %v678_v37, %v290_v32  ;;  %vm312_vm1 = vweird.f32 %v678_v37 }
 0x148   :  { %681 = vrcp.f32 %v291_v38  ;;  %vm313_vm3 = vmor %vm311_vm2, %vm312_vm1  ;;  %v332_v59 = vand.u32 2147483648, %v291_v38  ;;  %v330_v60 = vand.u32 2147483647, %v291_v38  ;;  %vm326_vm6 = vweird.f32 %v291_v38 }
 0x149   :  { %v308_v40 = vsub.f32 1.0, %v307_v39 }
 0x14a   :  { %v186_v41 = vpop.f32.mrf.mxu0  ;;  %v333_v4 = vor.u32 1.1754944e-38, %v332_v59  ;;  %vm331_vm8 = vcmp.eq.f32.partialorder %v330_v60, 8.507059e+37 }
 0x14b   :  { %v229_v42 = vmul.f32 %v941_v24, %v186_v41  ;;  %v309_v43 = vmul.f32 %v678_v37, %v308_v40 }
 0x14d   :  { %v680_v46 = vpop.eup %679  ;;  %v643_v47 = vmul.f32 -1.442695, %v229_v42  ;;  %v310_v48 = vadd.f32 %v678_v37, %v309_v43 }
 0x14e   :  { %v682_v49 = vpop.eup %681  ;;  %v292_v50 = vadd.f32 1.0, %v680_v46 }
 0x14f   :  { %683 = vpow2.f32 %v643_v47  ;;  %v322_v51 = vmul.f32 %v682_v49, %v291_v38  ;;  %v314_v52 = vsel %vm313_vm3, %v678_v37, %v310_v48  ;;  %vm327_vm5 = vweird.f32 %v682_v49 }
 0x150   :  { %685 = vrcp.f32 %v292_v50  ;;  %v947_v55 = vsel %vm316_vm4, %v318_v53, %v314_v52  ;;  %vm328_vm7 = vmor %vm326_vm6, %vm327_vm5  ;;  %v347_v10 = vand.u32 2147483648, %v292_v50  ;;  %v345_v11 = vand.u32 2147483647, %v292_v50 }
 0x151   :  { %v323_v54 = vsub.f32 1.0, %v322_v51  ;;  %546 = vst [vmem:[#allocation10] sm:$0xff] %v947_v55  ;;  %vm341_vm10 = vweird.f32 %v292_v50 }
 0x152   :  { %v189_v56 = vpop.f32.mrf.mxu0  ;;  %v348_v19 = vor.u32 1.1754944e-38, %v347_v10  ;;  %vm346_vm12 = vcmp.eq.f32.partialorder %v345_v11, 8.507059e+37 }
 0x153   :  { %v230_v57 = vmul.f32 %v941_v24, %v189_v56  ;;  %v324_v58 = vmul.f32 %v682_v49, %v323_v54 }
 0x155   :  { %v684_v61 = vpop.eup %683  ;;  %v644_v62 = vmul.f32 -1.442695, %v230_v57  ;;  %v325_v63 = vadd.f32 %v682_v49, %v324_v58 }
 0x156   :  { %v686_v0 = vpop.eup %685  ;;  %v293_v1 = vadd.f32 1.0, %v684_v61 }
 0x157   :  { %687 = vpow2.f32 %v644_v62  ;;  %v337_v2 = vmul.f32 %v686_v0, %v292_v50  ;;  %v329_v3 = vsel %vm328_vm7, %v682_v49, %v325_v63  ;;  %vm342_vm9 = vweird.f32 %v686_v0 }
 0x158   :  { %689 = vrcp.f32 %v293_v1  ;;  %v951_v6 = vsel %vm331_vm8, %v333_v4, %v329_v3  ;;  %vm343_vm11 = vmor %vm341_vm10, %vm342_vm9  ;;  %v362_v23 = vand.u32 2147483648, %v293_v1  ;;  %v360_v25 = vand.u32 2147483647, %v293_v1 }
 0x159   :  { %v338_v5 = vsub.f32 1.0, %v337_v2  ;;  %547 = vst [vmem:[#allocation10 + $0x8] sm:$0xff] %v951_v6  ;;  %vm356_vm14 = vweird.f32 %v293_v1 }
 0x15a   :  { %v192_v7 = vpop.f32.mrf.mxu0  ;;  %v363_v32 = vor.u32 1.1754944e-38, %v362_v23  ;;  %vm361_vm0 = vcmp.eq.f32.partialorder %v360_v25, 8.507059e+37 }
 0x15b   :  { %v231_v8 = vmul.f32 %v941_v24, %v192_v7  ;;  %v339_v9 = vmul.f32 %v686_v0, %v338_v5 }
 0x15d   :  { %v688_v12 = vpop.eup %687  ;;  %v645_v13 = vmul.f32 -1.442695, %v231_v8  ;;  %v340_v14 = vadd.f32 %v686_v0, %v339_v9 }
 0x15e   :  { %v690_v15 = vpop.eup %689  ;;  %v294_v16 = vadd.f32 1.0, %v688_v12 }
 0x15f   :  { %691 = vpow2.f32 %v645_v13  ;;  %v352_v17 = vmul.f32 %v690_v15, %v293_v1  ;;  %v344_v18 = vsel %vm343_vm11, %v686_v0, %v340_v14  ;;  %vm357_vm13 = vweird.f32 %v690_v15 }
 0x160   :  { %693 = vrcp.f32 %v294_v16  ;;  %v955_v21 = vsel %vm346_vm12, %v348_v19, %v344_v18  ;;  %vm358_vm15 = vmor %vm356_vm14, %vm357_vm13  ;;  %v377_v37 = vand.u32 2147483648, %v294_v16  ;;  %v375_v40 = vand.u32 2147483647, %v294_v16 }
 0x161   :  { %v353_v20 = vsub.f32 1.0, %v352_v17  ;;  %548 = vst [vmem:[#allocation10 + $0x10] sm:$0xff] %v955_v21  ;;  %vm371_vm2 = vweird.f32 %v294_v16 }
 0x162   :  { %v378_v43 = vor.u32 1.1754944e-38, %v377_v37  ;;  %vm376_vm4 = vcmp.eq.f32.partialorder %v375_v40, 8.507059e+37 }
 0x163   :  { %v354_v22 = vmul.f32 %v690_v15, %v353_v20 }
 0x165   :  { %v692_v26 = vpop.eup %691  ;;  %v355_v27 = vadd.f32 %v690_v15, %v354_v22 }
 0x166   :  { %v694_v28 = vpop.eup %693  ;;  %v295_v29 = vadd.f32 1.0, %v692_v26 }
 0x167   :  { %v367_v30 = vmul.f32 %v694_v28, %v294_v16  ;;  %v359_v31 = vsel %vm358_vm15, %v690_v15, %v355_v27  ;;  %vm372_vm1 = vweird.f32 %v694_v28 }
 0x168   :  { %695 = vrcp.f32 %v295_v29  ;;  %v195_v33 = vpop.f32.mrf.mxu2  ;;  %v959_v36 = vsel %vm361_vm0, %v363_v32, %v359_v31  ;;  %vm373_vm3 = vmor %vm371_vm2, %vm372_vm1  ;;  %v392_v50 = vand.u32 2147483648, %v295_v29  ;;  %v390_v54 = vand.u32 2147483647, %v295_v29 }
 0x169   :  { %v232_v34 = vmul.f32 %v941_v24, %v195_v33  ;;  %v368_v35 = vsub.f32 1.0, %v367_v30  ;;  %549 = vst [vmem:[#allocation10 + $0x18] sm:$0xff] %v959_v36  ;;  %vm386_vm6 = vweird.f32 %v295_v29 }
 0x16a   :  { %v393_v58 = vor.u32 1.1754944e-38, %v392_v50  ;;  %vm391_vm8 = vcmp.eq.f32.partialorder %v390_v54, 8.507059e+37 }
 0x16b   :  { %v646_v38 = vmul.f32 -1.442695, %v232_v34  ;;  %v369_v39 = vmul.f32 %v694_v28, %v368_v35 }
 0x16d   :  { %697 = vpow2.f32 %v646_v38  ;;  %v370_v41 = vadd.f32 %v694_v28, %v369_v39 }
 0x16e   :  { %v696_v42 = vpop.eup %695 }
 0x16f   :  { %v382_v44 = vmul.f32 %v696_v42, %v295_v29  ;;  %v374_v45 = vsel %vm373_vm3, %v694_v28, %v370_v41  ;;  %vm387_vm5 = vweird.f32 %v696_v42 }
 0x170   :  { %v198_v46 = vpop.f32.mrf.mxu2  ;;  %v962_v47 = vsel %vm376_vm4, %v378_v43, %v374_v45  ;;  %vm388_vm7 = vmor %vm386_vm6, %vm387_vm5 }
 0x171   :  { %v233_v48 = vmul.f32 %v941_v24, %v198_v46  ;;  %v383_v49 = vsub.f32 1.0, %v382_v44  ;;  %550 = vst [vmem:[#allocation10 + $0x20] sm:$0xff] %v962_v47 }
 0x173   :  { %v698_v51 = vpop.eup %697  ;;  %v647_v52 = vmul.f32 -1.442695, %v233_v48  ;;  %v384_v53 = vmul.f32 %v696_v42, %v383_v49 }
 0x174   :  { %v296_v56 = vadd.f32 1.0, %v698_v51 }
 0x175   :  { %699 = vpow2.f32 %v647_v52  ;;  %v385_v57 = vadd.f32 %v696_v42, %v384_v53 }
 0x176   :  { %701 = vrcp.f32 %v296_v56  ;;  %v407_v9 = vand.u32 2147483648, %v296_v56  ;;  %v405_v10 = vand.u32 2147483647, %v296_v56  ;;  %vm401_vm10 = vweird.f32 %v296_v56 }
 0x177   :  { %v389_v59 = vsel %vm388_vm7, %v696_v42, %v385_v57 }
 0x178   :  { %v201_v60 = vpop.f32.mrf.mxu2  ;;  %v966_v61 = vsel %vm391_vm8, %v393_v58, %v389_v59  ;;  %v408_v18 = vor.u32 1.1754944e-38, %v407_v9  ;;  %vm406_vm12 = vcmp.eq.f32.partialorder %v405_v10, 8.507059e+37 }
 0x179   :  { %v234_v62 = vmul.f32 %v941_v24, %v201_v60  ;;  %551 = vst [vmem:[#allocation10 + $0x28] sm:$0xff] %v966_v61 }
 0x17b   :  { %v700_v63 = vpop.eup %699  ;;  %v648_v0 = vmul.f32 -1.442695, %v234_v62 }
 0x17c   :  { %v702_v1 = vpop.eup %701  ;;  %v297_v2 = vadd.f32 1.0, %v700_v63 }
 0x17d   :  { %703 = vpow2.f32 %v648_v0  ;;  %v397_v3 = vmul.f32 %v702_v1, %v296_v56  ;;  %vm402_vm9 = vweird.f32 %v702_v1 }
 0x17e   :  { %705 = vrcp.f32 %v297_v2  ;;  %vm403_vm11 = vmor %vm401_vm10, %vm402_vm9  ;;  %v422_v26 = vand.u32 2147483648, %v297_v2  ;;  %v420_v27 = vand.u32 2147483647, %v297_v2  ;;  %vm416_vm14 = vweird.f32 %v297_v2 }
 0x17f   :  { %v398_v4 = vsub.f32 1.0, %v397_v3 }
 0x180   :  { %v204_v5 = vpop.f32.mrf.mxu2  ;;  %v423_v35 = vor.u32 1.1754944e-38, %v422_v26  ;;  %vm421_vm0 = vcmp.eq.f32.partialorder %v420_v27, 8.507059e+37 }
 0x181   :  { %v235_v7 = vmul.f32 %v941_v24, %v204_v5  ;;  %v399_v8 = vmul.f32 %v702_v1, %v398_v4 }
 0x183   :  { %v704_v11 = vpop.eup %703  ;;  %v649_v12 = vmul.f32 -1.442695, %v235_v7  ;;  %v400_v13 = vadd.f32 %v702_v1, %v399_v8 }
 0x184   :  { %v706_v14 = vpop.eup %705  ;;  %v298_v15 = vadd.f32 1.0, %v704_v11 }
 0x185   :  { %707 = vpow2.f32 %v649_v12  ;;  %v412_v16 = vmul.f32 %v706_v14, %v297_v2  ;;  %v404_v17 = vsel %vm403_vm11, %v702_v1, %v400_v13  ;;  %vm417_vm13 = vweird.f32 %v706_v14 }
 0x186   :  { %709 = vrcp.f32 %v298_v15  ;;  %v971_v20 = vsel %vm406_vm12, %v408_v18, %v404_v17  ;;  %vm418_vm15 = vmor %vm416_vm14, %vm417_vm13  ;;  %v437_v42 = vand.u32 2147483648, %v298_v15  ;;  %v435_v43 = vand.u32 2147483647, %v298_v15 }
 0x187   :  { %v413_v19 = vsub.f32 1.0, %v412_v16  ;;  %552 = vst [vmem:[#allocation10 + $0x30] sm:$0xff] %v971_v20  ;;  %vm431_vm2 = vweird.f32 %v298_v15 }
 0x188   :  { %v207_v22 = vpop.f32.mrf.mxu2  ;;  %v438_v52 = vor.u32 1.1754944e-38, %v437_v42  ;;  %vm436_vm4 = vcmp.eq.f32.partialorder %v435_v43, 8.507059e+37 }
 0x189   :  { %v236_v23 = vmul.f32 %v941_v24, %v207_v22  ;;  %v414_v25 = vmul.f32 %v706_v14, %v413_v19 }
 0x18b   :  { %v708_v28 = vpop.eup %707  ;;  %v650_v29 = vmul.f32 -1.442695, %v236_v23  ;;  %v415_v30 = vadd.f32 %v706_v14, %v414_v25 }
 0x18c   :  { %v710_v31 = vpop.eup %709  ;;  %v299_v32 = vadd.f32 1.0, %v708_v28 }
 0x18d   :  { %711 = vpow2.f32 %v650_v29  ;;  %v427_v33 = vmul.f32 %v710_v31, %v298_v15  ;;  %v419_v34 = vsel %vm418_vm15, %v706_v14, %v415_v30  ;;  %vm432_vm1 = vweird.f32 %v710_v31 }
 0x18e   :  { %713 = vrcp.f32 %v299_v32  ;;  %v975_v38 = vsel %vm421_vm0, %v423_v35, %v419_v34  ;;  %vm433_vm3 = vmor %vm431_vm2, %vm432_vm1  ;;  %v452_v59 = vand.u32 2147483648, %v299_v32  ;;  %v450_v60 = vand.u32 2147483647, %v299_v32 }
 0x18f   :  { %v428_v37 = vsub.f32 1.0, %v427_v33  ;;  %553 = vst [vmem:[#allocation10 + $0x38] sm:$0xff] %v975_v38  ;;  %vm446_vm6 = vweird.f32 %v299_v32 }
 0x190   :  { %v210_v39 = vpop.f32.mrf.mxu2  ;;  %v453_v5 = vor.u32 1.1754944e-38, %v452_v59  ;;  %vm451_vm8 = vcmp.eq.f32.partialorder %v450_v60, 8.507059e+37 }
 0x191   :  { %v237_v40 = vmul.f32 %v941_v24, %v210_v39  ;;  %v429_v41 = vmul.f32 %v710_v31, %v428_v37 }
 0x193   :  { %v712_v44 = vpop.eup %711  ;;  %v651_v45 = vmul.f32 -1.442695, %v237_v40  ;;  %v430_v46 = vadd.f32 %v710_v31, %v429_v41 }
 0x194   :  { %v714_v48 = vpop.eup %713  ;;  %v300_v49 = vadd.f32 1.0, %v712_v44 }
 0x195   :  { %715 = vpow2.f32 %v651_v45  ;;  %v442_v50 = vmul.f32 %v714_v48, %v299_v32  ;;  %v434_v51 = vsel %vm433_vm3, %v710_v31, %v430_v46  ;;  %vm447_vm5 = vweird.f32 %v714_v48 }
 0x196   :  { %717 = vrcp.f32 %v300_v49  ;;  %v979_v54 = vsel %vm436_vm4, %v438_v52, %v434_v51  ;;  %vm448_vm7 = vmor %vm446_vm6, %vm447_vm5  ;;  %v467_v12 = vand.u32 2147483648, %v300_v49  ;;  %v465_v13 = vand.u32 2147483647, %v300_v49 }
 0x197   :  { %v443_v53 = vsub.f32 1.0, %v442_v50  ;;  %554 = vst [vmem:[#allocation10 + $0x40] sm:$0xff] %v979_v54  ;;  %vm461_vm10 = vweird.f32 %v300_v49 }
 0x198   :  { %v213_v56 = vpop.f32.mrf.mxu3  ;;  %v468_v23 = vor.u32 1.1754944e-38, %v467_v12  ;;  %vm466_vm12 = vcmp.eq.f32.partialorder %v465_v13, 8.507059e+37 }
 0x199   :  { %v238_v57 = vmul.f32 %v941_v24, %v213_v56  ;;  %v444_v58 = vmul.f32 %v714_v48, %v443_v53 }
 0x19b   :  { %v716_v62 = vpop.eup %715  ;;  %v652_v63 = vmul.f32 -1.442695, %v238_v57  ;;  %v445_v0 = vadd.f32 %v714_v48, %v444_v58 }
 0x19c   :  { %v718_v1 = vpop.eup %717  ;;  %v301_v2 = vadd.f32 1.0, %v716_v62 }
 0x19d   :  { %719 = vpow2.f32 %v652_v63  ;;  %v457_v3 = vmul.f32 %v718_v1, %v300_v49  ;;  %v449_v4 = vsel %vm448_vm7, %v714_v48, %v445_v0  ;;  %vm462_vm9 = vweird.f32 %v718_v1 }
 0x19e   :  { %721 = vrcp.f32 %v301_v2  ;;  %v983_v8 = vsel %vm451_vm8, %v453_v5, %v449_v4  ;;  %vm463_vm11 = vmor %vm461_vm10, %vm462_vm9  ;;  %v482_v30 = vand.u32 2147483648, %v301_v2  ;;  %v480_v31 = vand.u32 2147483647, %v301_v2 }
 0x19f   :  { %v458_v7 = vsub.f32 1.0, %v457_v3  ;;  %555 = vst [vmem:[#allocation10 + $0x48] sm:$0xff] %v983_v8  ;;  %vm476_vm14 = vweird.f32 %v301_v2 }
 0x1a0   :  { %v216_v9 = vpop.f32.mrf.mxu3  ;;  %v483_v41 = vor.u32 1.1754944e-38, %v482_v30  ;;  %vm481_vm0 = vcmp.eq.f32.partialorder %v480_v31, 8.507059e+37 }
 0x1a1   :  { %v239_v10 = vmul.f32 %v941_v24, %v216_v9  ;;  %v459_v11 = vmul.f32 %v718_v1, %v458_v7 }
 0x1a3   :  { %v720_v14 = vpop.eup %719  ;;  %v653_v15 = vmul.f32 -1.442695, %v239_v10  ;;  %v460_v16 = vadd.f32 %v718_v1, %v459_v11 }
 0x1a4   :  { %v722_v17 = vpop.eup %721  ;;  %v302_v18 = vadd.f32 1.0, %v720_v14 }
 0x1a5   :  { %723 = vpow2.f32 %v653_v15  ;;  %v472_v19 = vmul.f32 %v722_v17, %v301_v2  ;;  %v464_v22 = vsel %vm463_vm11, %v718_v1, %v460_v16  ;;  %vm477_vm13 = vweird.f32 %v722_v17 }
 0x1a6   :  { %725 = vrcp.f32 %v302_v18  ;;  %v987_v26 = vsel %vm466_vm12, %v468_v23, %v464_v22  ;;  %vm478_vm15 = vmor %vm476_vm14, %vm477_vm13  ;;  %v497_v48 = vand.u32 2147483648, %v302_v18  ;;  %v495_v49 = vand.u32 2147483647, %v302_v18 }
 0x1a7   :  { %v473_v25 = vsub.f32 1.0, %v472_v19  ;;  %556 = vst [vmem:[#allocation10 + $0x50] sm:$0xff] %v987_v26  ;;  %vm491_vm2 = vweird.f32 %v302_v18 }
 0x1a8   :  { %v219_v27 = vpop.f32.mrf.mxu3  ;;  %v498_v59 = vor.u32 1.1754944e-38, %v497_v48  ;;  %vm496_vm4 = vcmp.eq.f32.partialorder %v495_v49, 8.507059e+37 }
 0x1a9   :  { %v240_v28 = vmul.f32 %v941_v24, %v219_v27  ;;  %v474_v29 = vmul.f32 %v722_v17, %v473_v25 }
 0x1ab   :  { %v724_v32 = vpop.eup %723  ;;  %v654_v33 = vmul.f32 -1.442695, %v240_v28  ;;  %v475_v34 = vadd.f32 %v722_v17, %v474_v29 }
 0x1ac   :  { %v726_v35 = vpop.eup %725  ;;  %v303_v37 = vadd.f32 1.0, %v724_v32 }
 0x1ad   :  { %727 = vpow2.f32 %v654_v33  ;;  %v487_v39 = vmul.f32 %v726_v35, %v302_v18  ;;  %v479_v40 = vsel %vm478_vm15, %v722_v17, %v475_v34  ;;  %vm492_vm1 = vweird.f32 %v726_v35 }
 0x1ae   :  { %729 = vrcp.f32 %v303_v37  ;;  %v991_v43 = vsel %vm481_vm0, %v483_v41, %v479_v40  ;;  %vm493_vm3 = vmor %vm491_vm2, %vm492_vm1  ;;  %v512_v63 = vand.u32 2147483648, %v303_v37  ;;  %v510_v0 = vand.u32 2147483647, %v303_v37 }
 0x1af   :  { %v488_v42 = vsub.f32 1.0, %v487_v39  ;;  %557 = vst [vmem:[#allocation10 + $0x58] sm:$0xff] %v991_v43  ;;  %vm506_vm6 = vweird.f32 %v303_v37 }
 0x1b0   :  { %v222_v44 = vpop.f32.mrf.mxu3  ;;  %v513_v9 = vor.u32 1.1754944e-38, %v512_v63  ;;  %vm511_vm8 = vcmp.eq.f32.partialorder %v510_v0, 8.507059e+37 }
 0x1b1   :  { %v241_v45 = vmul.f32 %v941_v24, %v222_v44  ;;  %v489_v46 = vmul.f32 %v726_v35, %v488_v42 }
 0x1b3   :  { %v728_v50 = vpop.eup %727  ;;  %v655_v51 = vmul.f32 -1.442695, %v241_v45  ;;  %v490_v52 = vadd.f32 %v726_v35, %v489_v46 }
 0x1b4   :  { %v730_v53 = vpop.eup %729  ;;  %v304_v56 = vadd.f32 1.0, %v728_v50 }
 0x1b5   :  { %731 = vpow2.f32 %v655_v51  ;;  %v502_v57 = vmul.f32 %v730_v53, %v303_v37  ;;  %v494_v58 = vsel %vm493_vm3, %v726_v35, %v490_v52  ;;  %vm507_vm5 = vweird.f32 %v730_v53 }
 0x1b6   :  { %733 = vrcp.f32 %v304_v56  ;;  %v499_v62 = vsel %vm496_vm4, %v498_v59, %v494_v58  ;;  %vm508_vm7 = vmor %vm506_vm6, %vm507_vm5  ;;  %v527_v12 = vand.u32 2147483648, %v304_v56  ;;  %v525_v14 = vand.u32 2147483647, %v304_v56 }
 0x1b7   :  { %v503_v60 = vsub.f32 1.0, %v502_v57  ;;  %558 = vst [vmem:[#allocation10 + $0x60] sm:$0xff] %v499_v62  ;;  %vm521_vm10 = vweird.f32 %v304_v56 }
 0x1b8   :  { %v528_v17 = vor.u32 1.1754944e-38, %v527_v12  ;;  %vm526_vm12 = vcmp.eq.f32.partialorder %v525_v14, 8.507059e+37 }
 0x1b9   :  { %v504_v24 = vmul.f32 %v730_v53, %v503_v60 }
 0x1bb   :  { %v732_v1 = vpop.eup %731  ;;  %v505_v2 = vadd.f32 %v730_v53, %v504_v24 }
 0x1bc   :  { %v734_v3 = vpop.eup %733  ;;  %v305_v4 = vadd.f32 1.0, %v732_v1 }
 0x1bd   :  { %v517_v5 = vmul.f32 %v734_v3, %v304_v56  ;;  %v509_v7 = vsel %vm508_vm7, %v730_v53, %v505_v2  ;;  %vm522_vm9 = vweird.f32 %v734_v3 }
 0x1be   :  { %735 = vrcp.f32 %v305_v4  ;;  %v514_v11 = vsel %vm511_vm8, %v513_v9, %v509_v7  ;;  %vm523_vm11 = vmor %vm521_vm10, %vm522_vm9  ;;  %v542_v25 = vand.u32 2147483648, %v305_v4  ;;  %v540_v28 = vand.u32 2147483647, %v305_v4 }
 0x1bf   :  { %v518_v10 = vsub.f32 1.0, %v517_v5  ;;  %559 = vst [vmem:[#allocation10 + $0x68] sm:$0xff] %v514_v11  ;;  %vm536_vm14 = vweird.f32 %v305_v4 }
 0x1c0   :  { %v543_v30 = vor.u32 1.1754944e-38, %v542_v25  ;;  %vm541_vm0 = vcmp.eq.f32.partialorder %v540_v28, 8.507059e+37 }
 0x1c1   :  { %v519_v13 = vmul.f32 %v734_v3, %v518_v10 }
 0x1c3   :  { %v520_v15 = vadd.f32 %v734_v3, %v519_v13 }
 0x1c4   :  { %v736_v16 = vpop.eup %735 }
 0x1c5   :  { %v532_v18 = vmul.f32 %v736_v16, %v305_v4  ;;  %v524_v19 = vsel %vm523_vm11, %v734_v3, %v520_v15  ;;  %vm537_vm13 = vweird.f32 %v736_v16 }
 0x1c6   :  { %v529_v22 = vsel %vm526_vm12, %v528_v17, %v524_v19  ;;  %vm538_vm15 = vmor %vm536_vm14, %vm537_vm13 }
 0x1c7   :  { %v533_v23 = vsub.f32 1.0, %v532_v18  ;;  %560 = vst [vmem:[#allocation10 + $0x70] sm:$0xff] %v529_v22 }
 0x1c9   :  { %v534_v27 = vmul.f32 %v736_v16, %v533_v23 }
 0x1cb   :  { %v535_v29 = vadd.f32 %v736_v16, %v534_v27 }
 0x1cd   :  { %v539_v31 = vsel %vm538_vm15, %v736_v16, %v535_v29 }
 0x1ce   :  { %v544_v32 = vsel %vm541_vm0, %v543_v30, %v539_v31 }
 0x1cf   :  { %561 = vst [vmem:[#allocation10 + $0x78] sm:$0xff] %v544_v32  ;;  %567 = vmatpush.xpose.msra.mxu1 %v544_v32 }
 0x1d0   :  { %611 = dma.vmem_to_hbm [thread:$0]  %s604_s13, 2048, %s606_s16, [#allocation11], %s866_s29, %s866_s29, %s867_s30  }
 0x1d3   :  { %568 = vmatpush.xpose.msra.mxu1 %v529_v22 }
 0x1d7   :  { %569 = vmatpush.xpose.msra.mxu1 %v514_v11 }
 0x1db   :  { %570 = vmatpush.xpose.msra.mxu1 %v499_v62 }
 0x1df   :  { %571 = vmatpush.xpose.msra.mxu1 %v991_v43 }
 0x1e3   :  { %572 = vmatpush.xpose.msra.mxu1 %v987_v26  ;;  %v562_v26 = vld [vmem:[#allocation3] sm:$0xff] }
 0x1e7   :  { %573 = vmatpush.xpose.msra.mxu1 %v983_v8 }
 0x1eb   :  { %574 = vmatpush.xpose.msra.mxu1 %v979_v54 }
 0x1ef   :  { %575 = vmatpush.xpose.msra.mxu1 %v975_v38 }
 0x1f3   :  { %576 = vmatpush.xpose.msra.mxu1 %v971_v20 }
 0x1f7   :  { %577 = vmatpush.xpose.msra.mxu1 %v966_v61 }
 0x1fb   :  { %578 = vmatpush.xpose.msra.mxu1 %v962_v47 }
 0x1ff   :  { %579 = vmatpush.xpose.msra.mxu1 %v959_v36 }
 0x203   :  { %580 = vmatpush.xpose.msra.mxu1 %v955_v21 }
 0x207   :  { %581 = vmatpush.xpose.msra.mxu1 %v951_v6  ;;  %v672_v6 = vld [vmem:[%s1023_s4] ss:$0 sm:$0xff] }
 0x20b   :  { %582 = vmatpush.xpose.msra.mxu1 %v947_v55 }
 0x20e   :  { %583 = vmatmul.f32.vlgmr.msra.gmra.mxu1 %v562_v26 }
 0x28b   :  { %v584_v55 = vpop.f32.mrf.mxu1 }
 0x28c   :  { %v585_v21 = vadd.f32 %v672_v6, %v584_v55 }
 0x28e   :  { %587 = vst [vmem:[#allocation9] sm:$0xff] %v585_v21 }
 0x28f   :  { %598 = dma.vmem_to_hbm [thread:$0]  %s594_s20, 128, %s596_s23, [#allocation5]  }
 0x290   :  { %861 = dma.done.wait [#allocation5], 128  }
 0x291   :  { %862 = vsyncadd [#allocation5], 4294967168 }
 0x292   :  { %863 = dma.done.wait [#allocation11], 2048  }
 0x293   :  { %864 = vsyncadd [#allocation11], 4294965248 }
 0x294   :  { %620 = vsyncpa [#allocation4], 1 }
 0x295   :  { %621 = vsyncpa [#allocation7], 1 }
 0x296   :  { %622 = vsyncpa [#allocation5], 1 }
 0x297   :  { %623 = vsyncpa [#allocation11], 1 }

</bundles_post_ra>
